<compile_context>
chip_gen: v7x
topology: tpu7x:2x2x1
jax: 0.10.0
libtpu: 0.0.40
codegen_flags: <defaults>
</compile_context>

<pallas_src>
import functools

import jax
import jax.numpy as jnp
from jax.experimental import pallas as pl
from jax.experimental.pallas import tpu as pltpu

_EPS = 1e-5  # PyTorch InstanceNorm2d default
# NOTE: both convs in the PyTorch module use bias=False, so no conv-bias term
# is needed (InstanceNorm would cancel a per-channel bias anyway).


# ----------------------------- fused epilogue -------------------------------
def _norm_act(y, gamma, beta, *, groups, count, act_is_relu, out_dtype):
    """InstanceNorm(affine) + (Leaky)ReLU on a (G*Co, HWp) f32 tile.

    Rows are group-major (row = g*Co + c); padded HW columns are zero in `y`
    so they are inert in the sums — `count` is the true spatial count.
    """
    gco = y.shape[0]
    co = gco // groups
    inv_count = 1.0 / float(count)

    row_sum = jnp.sum(y, axis=1, keepdims=True)          # (GCo, 1)
    row_sq = jnp.sum(y * y, axis=1, keepdims=True)       # (GCo, 1)
    if groups == 1:
        ch_sum, ch_sq = row_sum, row_sq                  # (Co, 1)
    else:  # aggregate the G phase groups per channel (static sublane slices)
        ch_sum = row_sum[0:co]
        ch_sq = row_sq[0:co]
        for g in range(1, groups):
            ch_sum = ch_sum + row_sum[g * co:(g + 1) * co]
            ch_sq = ch_sq + row_sq[g * co:(g + 1) * co]

    mean = ch_sum * inv_count                            # (Co, 1)
    var = ch_sq * inv_count - mean * mean                # single-pass variance
    var = jnp.maximum(var, 0.0)                          # guard tiny negatives
    inv = jax.lax.rsqrt(var + _EPS)
    scale = inv * gamma                                  # (Co, 1)
    shift = beta - mean * scale                          # (Co, 1)
    if groups > 1:                                       # (Co,1) -> (GCo,1)
        scale = jnp.concatenate([scale] * groups, axis=0)
        shift = jnp.concatenate([shift] * groups, axis=0)

    z = y * scale + shift                                # broadcast over HWp
    if act_is_relu:
        z = jnp.maximum(z, 0.0)
    else:                                                # LeakyReLU(0.2)
        z = jnp.where(z > 0.0, z, 0.2 * z)
    return z.astype(out_dtype)


# ----------------------------- Pallas kernels -------------------------------
def _block_kernel_single(p_ref, w_ref, g_ref, b_ref, o_ref, *,
                         act_is_relu, groups, count):
    # Full K in one step: no accumulator scratch, epilogue fused in-line.
    y = jnp.dot(w_ref[...], p_ref[...], preferred_element_type=jnp.float32)
    o_ref[...] = _norm_act(y, g_ref[...], b_ref[...], groups=groups,
                           count=count, act_is_relu=act_is_relu,
                           out_dtype=o_ref.dtype)


def _block_kernel_multi(p_ref, w_ref, g_ref, b_ref, o_ref, acc_ref, *,
                        act_is_relu, groups, count, k_tile, w_resident):
    # p_ref  : (tk, HWp)        bf16 patches^T tile (one instance, one K tile)
    # w_ref  : (GCo, K) or (GCo, tk)  bf16 fused weights
    # o_ref  : (GCo, HWp)       bf16 output block (resident across K axis)
    # acc_ref: (GCo, HWp)       f32 accumulator scratch
    k = pl.program_id(1)

    @pl.when(k == 0)
    def _init():
        acc_ref[...] = jnp.zeros_like(acc_ref)

    if w_resident:  # full weight resident in VMEM; slice the K window here
        koff = pl.multiple_of(k * k_tile, k_tile)
        w = w_ref[:, pl.ds(koff, k_tile)]
    else:
        w = w_ref[...]
    acc_ref[...] += jnp.dot(w, p_ref[...], preferred_element_type=jnp.float32)

    @pl.when(k == pl.num_programs(1) - 1)
    def _finalize():
        o_ref[...] = _norm_act(acc_ref[...], g_ref[...], b_ref[...],
                               groups=groups, count=count,
                               act_is_relu=act_is_relu, out_dtype=o_ref.dtype)


# --------------------------- tiling / VMEM plan ------------------------------
def _vmem_budget():
    cap = 128 * 2**20
    try:  # generation-aware: ~104 MiB on v5e/v6e (128 MiB), ~52 MiB on v7x (64 MiB)
        cap = int(pltpu.get_tpu_info().vmem_capacity_bytes)
    except Exception:
        pass
    return (cap * 13) // 16


def _plan_k_tiling(k_pad, hwp, gco, budget):
    """Returns (tk, w_resident). tk == k_pad selects the single-step kernel."""
    out_b = 2 * gco * hwp * 2                     # bf16 output, double-buffered
    slack = 1 << 20

    def fits(tk, resident):
        p_b = 2 * tk * hwp * 2                    # bf16 patches, double-buffered
        w_b = 4 * gco * (k_pad if resident else tk)
        acc_b = 0 if tk == k_pad else gco * hwp * 4
        return p_b + w_b + acc_b + out_b + slack <= budget

    if fits(k_pad, True):
        return k_pad, True
    cands = [c for c in (8192, 4096, 2048, 1024, 512, 256, 128)
             if c < k_pad and k_pad % c == 0]
    for tk in cands:                              # prefer VMEM-resident weights
        if fits(tk, True):
            return tk, True
    for tk in cands:
        if fits(tk, False):
            return tk, False
    return 128, False


def _run_block_kernel(patches, w2d, gamma, beta, act, groups, count,
                      out_dtype):
    n, k_pad, hwp = patches.shape
    gco = w2d.shape[0]
    co = gco // groups
    budget = _vmem_budget()
    tk, w_resident = _plan_k_tiling(k_pad, hwp, gco, budget)
    act_is_relu = (act == "relu")

    if tk == k_pad:
        kernel = functools.partial(_block_kernel_single,
                                   act_is_relu=act_is_relu, groups=groups,
                                   count=count)
        grid = (n,)
        in_specs = [
            pl.BlockSpec((None, k_pad, hwp), lambda i: (i, 0, 0)),
            pl.BlockSpec((gco, k_pad), lambda i: (0, 0)),   # fetched once
            pl.BlockSpec((co, 1), lambda i: (0, 0)),
            pl.BlockSpec((co, 1), lambda i: (0, 0)),
        ]
        out_specs = pl.BlockSpec((None, gco, hwp), lambda i: (i, 0, 0))
        scratch_shapes = []
        dims = ("parallel",)
    else:
        kernel = functools.partial(_block_kernel_multi,
                                   act_is_relu=act_is_relu, groups=groups,
                                   count=count, k_tile=tk,
                                   w_resident=w_resident)
        grid = (n, k_pad // tk)
        if w_resident:
            w_spec = pl.BlockSpec((gco, k_pad), lambda i, k: (0, 0))
        else:
            w_spec = pl.BlockSpec((gco, tk), lambda i, k: (0, k))
        in_specs = [
            pl.BlockSpec((None, tk, hwp), lambda i, k: (i, k, 0)),
            w_spec,
            pl.BlockSpec((co, 1), lambda i, k: (0, 0)),
            pl.BlockSpec((co, 1), lambda i, k: (0, 0)),
        ]
        out_specs = pl.BlockSpec((None, gco, hwp), lambda i, k: (i, 0, 0))
        scratch_shapes = [pltpu.VMEM((gco, hwp), jnp.float32)]
        dims = ("parallel", "arbitrary")

    # TODO(synk): add a "parallel" Co-tile grid axis for v7x's two TensorCores
    # when batch == 1 (InstanceNorm stats are per-channel so no cross-tile
    # reduction would be needed).
    return pl.pallas_call(
        kernel,
        out_shape=jax.ShapeDtypeStruct((n, gco, hwp), out_dtype),
        grid_spec=pltpu.PrefetchScalarGridSpec(
            num_scalar_prefetch=0,
            grid=grid,
            in_specs=in_specs,
            out_specs=out_specs,
            scratch_shapes=scratch_shapes,
        ),
        compiler_params=pltpu.CompilerParams(
            dimension_semantics=dims,
            vmem_limit_bytes=int(budget),
        ),
    )(patches, w2d, gamma, beta)


# --------------------------- JAX glue (layout) ------------------------------
def _pad_axis_to(x, axis, multiple):
    pad = (-x.shape[axis]) % multiple
    if pad == 0:
        return x
    widths = [(0, 0)] * x.ndim
    widths[axis] = (0, pad)
    return jnp.pad(x, widths)


def _patches_down(x):
    # Conv2d(k=4, s=2, p=1, padding_mode='reflect'): 16 taps, K = 16*Cin,
    # patches laid out (N, K, Ho*Wo) so spatial sits on the lane axis.
    n, c, h, w = x.shape
    ho, wo = h // 2, w // 2
    xp = jnp.pad(x, ((0, 0), (0, 0), (1, 1), (1, 1)), mode="reflect")
    taps = []
    for kh in range(4):
        for kw in range(4):
            taps.append(xp[:, :, kh:kh + 2 * ho:2, kw:kw + 2 * wo:2])
    p = jnp.stack(taps, axis=1).reshape(n, 16 * c, ho * wo)
    return p, (ho, wo)


def _patches_up(x):
    # ConvTranspose2d(k=4, s=2, p=1) via sub-pixel phase decomposition:
    # 3x3 zero-padded neighbourhood taps (K = 9*Cin); each of the 4 output
    # phases selects 4 of the 9 taps.  No zero-dilated input is materialized.
    n, c, h, w = x.shape
    xp = jnp.pad(x, ((0, 0), (0, 0), (1, 1), (1, 1)))
    taps = []
    for dr in range(3):
        for dc in range(3):
            taps.append(xp[:, :, dr:dr + h, dc:dc + w])
    p = jnp.stack(taps, axis=1).reshape(n, 9 * c, h * w)
    return p, (h, w)


def _up_weight_groups(weight):
    # weight: (Cin, Cout, 4, 4)  ->  (4 phases, Cout, 9*Cin)
    # out[co, 2r+ph, 2s+pw] = sum_{ci,taps} x[ci, r+dr-1, s+dc-1] * W[ci,co,kh,kw]
    # with (dr,kh)/(dc,kw) given by the phase parity tables below.
    c_in, c_out = weight.shape[0], weight.shape[1]
    row_taps = {0: ((0, 3), (1, 1)), 1: ((1, 2), (2, 0))}   # ph -> ((dr, kh), ...)
    col_taps = {0: ((0, 3), (1, 1)), 1: ((1, 2), (2, 0))}   # pw -> ((dc, kw), ...)
    w = jnp.zeros((4, c_out, 9, c_in), weight.dtype)
    for ph in range(2):
        for pw in range(2):
            g = ph * 2 + pw
            for dr, kh in row_taps[ph]:
                for dc, kw in col_taps[pw]:
                    w = w.at[g, :, dr * 3 + dc, :].set(weight[:, :, kh, kw].T)
    return w.reshape(4, c_out, 9 * c_in)


def block_forward(x, weight, gamma, beta, *, down=True, act="relu",
                  use_dropout=False, out_dtype=jnp.bfloat16):
    """Pallas implementation of pix2pix Block.forward (inference)."""
    n = x.shape[0]
    if down:
        co, c_in = weight.shape[0], weight.shape[1]
        # (Co, Cin, 4, 4) -> (Co, 16*Cin) with K index (kh*4+kw)*Cin + ci
        w2d = weight.transpose(0, 2, 3, 1).reshape(co, 16 * c_in)
        groups = 1
        patches, (ho, wo) = _patches_down(x)
        hw = ho * wo
    else:
        c_in, co = weight.shape[0], weight.shape[1]
        w2d = _up_weight_groups(weight).reshape(4 * co, 9 * c_in)  # group-major
        groups = 4
        patches, (h, w) = _patches_up(x)
        hw = h * w
        ho, wo = 2 * h, 2 * w

    count = groups * hw  # true spatial positions per (instance, channel)

    # bf16 operands (f32 MXU accumulation inside the kernel); pad K to a
    # multiple of 128 (zeros are inert) and pad HW to a multiple of 128 so the
    # output/store path is lane-dense.
    # TODO(synk): the down-path im2col still expands HBM reads 16x; a fully
    # in-kernel tap accumulation over the raw padded image would remove it.
    patches = _pad_axis_to(patches, 1, 128)
    patches = _pad_axis_to(patches, 2, 128).astype(jnp.bfloat16)
    w2d = _pad_axis_to(w2d, 1, 128).astype(jnp.bfloat16)

    out = _run_block_kernel(patches, w2d,
                            gamma.astype(jnp.float32).reshape(-1, 1),
                            beta.astype(jnp.float32).reshape(-1, 1),
                            act, groups, count, out_dtype)
    out = out[:, :, :hw]  # strip HW lane padding

    if down:
        out = out.reshape(n, co, ho, wo)
    else:
        h, w = ho // 2, wo // 2
        out = (out.reshape(n, 2, 2, co, h, w)
                  .transpose(0, 3, 4, 1, 5, 2)
                  .reshape(n, co, ho, wo))

    if use_dropout:
        # TODO(synk): training-mode Dropout(0.5) (stochastic mask + 2x scale)
        # not implemented; treated as eval-mode identity here.
        pass
    return out


# ----------------------------- pure-JAX reference ---------------------------
def _ref_forward(x, weight, gamma, beta, *, down, act):
    dn = ("NCHW", "OIHW", "NCHW")
    if down:
        xp = jnp.pad(x, ((0, 0), (0, 0), (1, 1), (1, 1)), mode="reflect")
        y = jax.lax.conv_general_dilated(xp, weight, (2, 2), "VALID",
                                         dimension_numbers=dn)
    else:
        w_flip = jnp.flip(weight, axis=(2, 3)).transpose(1, 0, 2, 3)
        y = jax.lax.conv_general_dilated(x, w_flip, (1, 1), ((2, 2), (2, 2)),
                                         lhs_dilation=(2, 2),
                                         dimension_numbers=dn)
    mean = y.mean(axis=(2, 3), keepdims=True)
    var = ((y - mean) ** 2).mean(axis=(2, 3), keepdims=True)
    z = (y - mean) / jnp.sqrt(var + _EPS)
    z = z * gamma.reshape(1, -1, 1, 1) + beta.reshape(1, -1, 1, 1)
    return jnp.maximum(z, 0.0) if act == "relu" else jnp.where(z > 0, z, 0.2 * z)


# ---------------------------------- main ------------------------------------
if __name__ == "__main__":
    key = jax.random.PRNGKey(0)
    k_x, k_w, k_g, k_b, k_x2, k_w2 = jax.random.split(key, 6)

    def _bf16_round(a):  # make inputs bf16-exact so kernel/reference agree
        return a.astype(jnp.bfloat16).astype(jnp.float32)

    # ---- down block (down=True, act='relu', no dropout) --------------------
    N, C_in, C_out, H, W = 2, 4, 8, 16, 16
    x = _bf16_round(jax.random.normal(k_x, (N, C_in, H, W), jnp.float32))
    w_down = _bf16_round(0.1 * jax.random.normal(k_w, (C_out, C_in, 4, 4),
                                                 jnp.float32))
    gamma = 1.0 + 0.1 * jax.random.normal(k_g, (C_out,), jnp.float32)
    beta = 0.1 * jax.random.normal(k_b, (C_out,), jnp.float32)

    out_down = jax.block_until_ready(
        block_forward(x, w_down, gamma, beta, down=True, act="relu"))
    ref_down = _ref_forward(x, w_down, gamma, beta, down=True, act="relu")
    assert out_down.shape == (N, C_out, H // 2, W // 2)
    err_d = float(jnp.max(jnp.abs(out_down.astype(jnp.float32) - ref_down)))
    assert jnp.allclose(out_down.astype(jnp.float32), ref_down,
                        atol=1e-2, rtol=1e-2), err_d

    # ---- up block (down=False, act='leaky') --------------------------------
    N2, C_in2, C_out2, H2, W2 = 2, 8, 4, 8, 8
    x2 = _bf16_round(jax.random.normal(k_x2, (N2, C_in2, H2, W2), jnp.float32))
    w_up = _bf16_round(0.1 * jax.random.normal(k_w2, (C_in2, C_out2, 4, 4),
                                               jnp.float32))
    gamma2 = 1.0 + 0.1 * jax.random.normal(k_g, (C_out2,), jnp.float32)
    beta2 = 0.1 * jax.random.normal(k_b, (C_out2,), jnp.float32)

    out_up = jax.block_until_ready(
        block_forward(x2, w_up, gamma2, beta2, down=False, act="leaky"))
    ref_up = _ref_forward(x2, w_up, gamma2, beta2, down=False, act="leaky")
    assert out_up.shape == (N2, C_out2, 2 * H2, 2 * W2)
    err_u = float(jnp.max(jnp.abs(out_up.astype(jnp.float32) - ref_up)))
    assert jnp.allclose(out_up.astype(jnp.float32), ref_up,
                        atol=1e-2, rtol=1e-2), err_u

    print("KERNEL_OK")
</pallas_src>

<mosaic_0001>
module attributes {stable_mosaic.version = 11 : i64} {
  func.func @_block_kernel_single(%arg0: i32, %arg1: memref<1x128x128xbf16, #tpu.memory_space<vmem>>, %arg2: memref<8x128xbf16, #tpu.memory_space<vmem>>, %arg3: memref<8x1xf32, #tpu.memory_space<vmem>>, %arg4: memref<8x1xf32, #tpu.memory_space<vmem>>, %arg5: memref<1x8x128xbf16, #tpu.memory_space<vmem>>) attributes {dimension_semantics = [#tpu.dimension_semantics<parallel>], iteration_bounds = array<i64: 2>, scalar_prefetch = 0 : i64, scratch_operands = 0 : i64, tpu.core_type = #tpu.core_type<tc>, window_params = [{transform_indices = @transform_0, window_bounds = array<i64: 1, 128, 128>}, {pipeline_mode = #tpu.pipeline_mode<synchronous>, transform_indices = @transform_1, window_bounds = array<i64: 8, 128>}, {pipeline_mode = #tpu.pipeline_mode<synchronous>, transform_indices = @transform_2, window_bounds = array<i64: 8, 1>}, {pipeline_mode = #tpu.pipeline_mode<synchronous>, transform_indices = @transform_3, window_bounds = array<i64: 8, 1>}, {transform_indices = @transform_4, window_bounds = array<i64: 1, 8, 128>}]} {
    %c0 = arith.constant 0 : index
    %c0_0 = arith.constant 0 : index
    %0 = vector.load %arg2[%c0, %c0_0] : memref<8x128xbf16, #tpu.memory_space<vmem>>, vector<8x128xbf16>
    %c0_1 = arith.constant 0 : index
    %c0_2 = arith.constant 0 : index
    %c0_3 = arith.constant 0 : index
    %1 = vector.load %arg1[%c0_1, %c0_2, %c0_3] : memref<1x128x128xbf16, #tpu.memory_space<vmem>>, vector<1x128x128xbf16>
    %2 = vector.shape_cast %1 : vector<1x128x128xbf16> to vector<128x128xbf16>
    %cst = arith.constant dense<0.000000e+00> : vector<8x128xf32>
    %3 = tpu.matmul %0, %2, %cst {dimension_numbers = #tpu.dot_dimension_numbers<[1], [0], [0], [1], [0, 0, 1, 1], [], []>} : vector<8x128xbf16>, vector<128x128xbf16>, vector<8x128xf32> -> vector<8x128xf32>
    %c0_4 = arith.constant 0 : index
    %c0_5 = arith.constant 0 : index
    %4 = vector.load %arg3[%c0_4, %c0_5] : memref<8x1xf32, #tpu.memory_space<vmem>>, vector<8x1xf32>
    %c0_6 = arith.constant 0 : index
    %c0_7 = arith.constant 0 : index
    %5 = vector.load %arg4[%c0_6, %c0_7] : memref<8x1xf32, #tpu.memory_space<vmem>>, vector<8x1xf32>
    %cst_8 = arith.constant dense<0.000000e+00> : vector<8xf32>
    %6 = vector.multi_reduction <add>, %3, %cst_8 [1] : vector<8x128xf32> to vector<8xf32>
    %7 = vector.shape_cast %6 : vector<8xf32> to vector<8x1xf32>
    %8 = arith.mulf %3, %3 : vector<8x128xf32>
    %cst_9 = arith.constant dense<0.000000e+00> : vector<8xf32>
    %9 = vector.multi_reduction <add>, %8, %cst_9 [1] : vector<8x128xf32> to vector<8xf32>
    %10 = vector.shape_cast %9 : vector<8xf32> to vector<8x1xf32>
    %cst_10 = arith.constant 1.562500e-02 : f32
    %11 = vector.broadcast %cst_10 : f32 to vector<8x1xf32>
    %12 = arith.mulf %7, %11 : vector<8x1xf32>
    %cst_11 = arith.constant 1.562500e-02 : f32
    %13 = vector.broadcast %cst_11 : f32 to vector<8x1xf32>
    %14 = arith.mulf %10, %13 : vector<8x1xf32>
    %15 = arith.mulf %12, %12 : vector<8x1xf32>
    %16 = arith.subf %14, %15 : vector<8x1xf32>
    %cst_12 = arith.constant 0.000000e+00 : f32
    %17 = vector.broadcast %cst_12 : f32 to vector<8x1xf32>
    %18 = arith.maximumf %16, %17 : vector<8x1xf32>
    %cst_13 = arith.constant 9.99999974E-6 : f32
    %19 = vector.broadcast %cst_13 : f32 to vector<8x1xf32>
    %20 = arith.addf %18, %19 : vector<8x1xf32>
    %21 = math.rsqrt %20 : vector<8x1xf32>
    %22 = arith.mulf %21, %4 : vector<8x1xf32>
    %23 = arith.mulf %12, %22 : vector<8x1xf32>
    %24 = arith.subf %5, %23 : vector<8x1xf32>
    %25 = vector.broadcast %22 : vector<8x1xf32> to vector<8x128xf32>
    %26 = arith.mulf %3, %25 : vector<8x128xf32>
    %27 = vector.broadcast %24 : vector<8x1xf32> to vector<8x128xf32>
    %28 = arith.addf %26, %27 : vector<8x128xf32>
    %cst_14 = arith.constant 0.000000e+00 : f32
    %29 = vector.broadcast %cst_14 : f32 to vector<8x128xf32>
    %30 = arith.maximumf %28, %29 : vector<8x128xf32>
    %31 = arith.truncf %30 : vector<8x128xf32> to vector<8x128xbf16>
    %c0_15 = arith.constant 0 : index
    %c0_16 = arith.constant 0 : index
    %c0_17 = arith.constant 0 : index
    %32 = vector.load %arg5[%c0_15, %c0_16, %c0_17] : memref<1x8x128xbf16, #tpu.memory_space<vmem>>, vector<1x8x128xbf16>
    %33 = vector.shape_cast %32 : vector<1x8x128xbf16> to vector<8x128xbf16>
    %34 = vector.shape_cast %31 : vector<8x128xbf16> to vector<1x8x128xbf16>
    tpu.vector_store %arg5[%c0_15, %c0_16, %c0_17], %34 {strides = array<i32>} : memref<1x8x128xbf16, #tpu.memory_space<vmem>>, vector<1x8x128xbf16>,
    return
  }
  func.func @transform_0(%arg0: i32) -> (i32, i32, i32) {
    %c0_i32 = arith.constant 0 : i32
    %c0_i32_0 = arith.constant 0 : i32
    %c0_i32_1 = arith.constant 0 : i32
    return %arg0, %c0_i32, %c0_i32_0 : i32, i32, i32
  }
  func.func @transform_1(%arg0: i32) -> (i32, i32) {
    %c0_i32 = arith.constant 0 : i32
    %c0_i32_0 = arith.constant 0 : i32
    %c0_i32_1 = arith.constant 0 : i32
    return %c0_i32, %c0_i32_0 : i32, i32
  }
  func.func @transform_2(%arg0: i32) -> (i32, i32) {
    %c0_i32 = arith.constant 0 : i32
    %c0_i32_0 = arith.constant 0 : i32
    %c0_i32_1 = arith.constant 0 : i32
    return %c0_i32, %c0_i32_0 : i32, i32
  }
  func.func @transform_3(%arg0: i32) -> (i32, i32) {
    %c0_i32 = arith.constant 0 : i32
    %c0_i32_0 = arith.constant 0 : i32
    %c0_i32_1 = arith.constant 0 : i32
    return %c0_i32, %c0_i32_0 : i32, i32
  }
  func.func @transform_4(%arg0: i32) -> (i32, i32, i32) {
    %c0_i32 = arith.constant 0 : i32
    %c0_i32_0 = arith.constant 0 : i32
    %c0_i32_1 = arith.constant 0 : i32
    return %arg0, %c0_i32, %c0_i32_0 : i32, i32, i32
  }
}

</mosaic_0001>

<bundles_post_ra>
// kernel: tpu_custom_call.1
= control target key start
LH: loop header
LB: loop body
LE: loop exit
PB: predicated region body
PF: predicated region fallthrough
CT: control target
= control target key end

     0   :  { %9 = vsyncpa [#allocation3], 0  ;;  %s1146_s0 = inlined_call_operand.hbm [shape: bf16[2,128,128], index: 0, kind: input, shape index: {}]   ;;  %s1147_s1 = inlined_call_operand.hbm [shape: bf16[8,128], index: 1, kind: input, shape index: {}]   ;;  %s1148_s2 = inlined_call_operand.hbm [shape: f32[8,1], index: 2, kind: input, shape index: {}]   ;;  %s1149_s3 = inlined_call_operand.hbm [shape: f32[8,1], index: 3, kind: input, shape index: {}]   ;;  %s1150_s4 = inlined_call_operand.hbm [shape: bf16[2,8,128], index: 4, kind: output, shape index: {}]  }
   0x1   :  { %11 = vsyncpa [#allocation3 + $0x1], 0 }
   0x2   :  { %12 = vsyncpa [#allocation6], 0 }
   0x3   :  { %13 = vsyncpa [#allocation9], 0 }
   0x4   :  { %14 = vsyncpa [#allocation4], 0 }
   0x5   :  { %16 = vsyncpa [#allocation4 + $0x1], 0  ;;  %s881_s15 = smov 0   ;;  %s883_s16 = smov 0  }
   0x6   :  { %s885_s17 = smov 0   ;;  %s887_s18 = smov 0  }
   0x7 LB: > { %s902_s19 = sadd.s32 4294967295, %s844_s18   ;;  %s505_s20 = sadd.s32 4294967294, %s844_s18   ;;  %s844_s18 = sphi %s887_s18, %s1173_s18   ;;  %s840_s17 = sphi %s885_s17, %s1172_s17   ;;  %s836_s16 = sphi %s883_s16, %s1171_s16   ;;  %s832_s15 = sphi %s881_s15, %s1170_s15  }
   0x8   : > { %p42_p0 = scmp.ne.s32.totalorder %s836_s16, %s832_s15  ;;  %p1151_p1 = scmp.eq.s32.totalorder %s902_s19, 0 }
   0x9   : > { %p135_p3 = scmp.eq.s32.totalorder %s505_s20, 1  ;;  %p506_p5 = scmp.ge.s32.totalorder %s844_s18, 1 }
   0xa   : > { %p911_p4 = por %p1151_p1, %p42_p0  ;;  %p142_p7 = scmp.lt.s32.totalorder %s844_s18, 3 }
   0xb   : > { %p916_p6 = por %p135_p3, %p42_p0  ;;  %s846_s24 = smov [#allocation5]  }
   0xc   : > { %s1154_s21 = scalar_select %p911_p4, 1, 0 }
   0xd   : > { %s1155_s22 = scalar_select %p916_p6, 1, 0 }
   0xe   : > { %p921_p8 = pnand %p506_p5, %p142_p7  ;;  %s155_s25 = sshll.u32 %s846_s24, 4  ;;  %s156_s25 = int_to_ptr.vmem [resolvable:$true] %s155_s25 }
   0xf   : > { %s847_s26 = smov [#allocation7]   ;;  %s848_s29 = smov [#allocation8]  }
  0x10   : > { %s1156_s23 = scalar_select %p921_p8, 1, 0 }
  0x11   : > { %p578_p10 = pneg %p921_p8  ;;  %s166_s27 = sshll.u32 %s847_s26, 4  ;;  %s934_s27 = int_to_ptr.vmem [resolvable:$true] %s166_s27 }
  0x12   : > { %s177_s30 = sshll.u32 %s848_s29, 4  ;;  %s656_s7 = scalar_lea.hbm %s1147_s1, 64  ;;  %s936_s30 = int_to_ptr.vmem [resolvable:$true] %s177_s30 }
  0x13   : > { %p930_p11 = pnand %p578_p10, %p1151_p1  ;;  %p657_p12 = scmp.ne.s32.totalorder %s1147_s1, %s656_s7 }
  0x14   : > { %p663_p5 = scmp.lt.u32.totalorder %s656_s7, %s1147_s1 }
  0x15   : > { %p946_p13 = pneg %p930_p11 }
  0x17   : > { %p659_p0 = pnand %p946_p13, %p657_p12 }
  0x19   : > { %p660_p3 = pneg %p659_p0 }
  0x1b   : > { %p665_p7 = pnand %p663_p5, %p660_p3 }
  0x1d   : > { %668 = shalt.err (!%p665_p7)
}
  0x1e   : > { %s669_s13 = scalar_lea.vmem %s156_s25, 64  ;;  %p677_p2 = scmp.lt.s32.totalorder %s156_s25, %s156_s25 }
  0x1f   : > { %p670_p10 = scmp.ne.s32.totalorder %s156_s25, %s669_s13  ;;  %p678_p6 = scmp.lt.s32.totalorder %s669_s13, %s669_s13 }
  0x21   : > { %p672_p9 = pnand %p670_p10, %p946_p13  ;;  %p679_p4 = por %p678_p6, %p677_p2 }
  0x23   : > { %p673_p1 = pneg %p672_p9 }
  0x25   : > { %p680_p8 = pnand %p679_p4, %p673_p1 }
  0x27   : > { %683 = shalt.err (!%p680_p8)
}
  0x28   : > { %581 = dma.hbm_to_vmem [thread:$0]  (!%p930_p11), %s1147_s1, 64, %s156_s25, [#allocation6]  }
  0x29   : > { %s684_s29 = scalar_lea.hbm %s1148_s2, 128 }
  0x2a   : > { %p685_p9 = scmp.ne.s32.totalorder %s1148_s2, %s684_s29  ;;  %p691_p1 = scmp.lt.u32.totalorder %s684_s29, %s1148_s2 }
  0x2c   : > { %p687_p12 = pnand %p685_p9, %p946_p13 }
  0x2e   : > { %p688_p2 = pneg %p687_p12 }
  0x30   : > { %p693_p4 = pnand %p691_p1, %p688_p2 }
  0x32   : > { %696 = shalt.err (!%p693_p4)
}
  0x33   : > { %s697_s25 = scalar_lea.vmem %s934_s27, 128  ;;  %p705_p3 = scmp.lt.s32.totalorder %s934_s27, %s934_s27 }
  0x34   : > { %p698_p6 = scmp.ne.s32.totalorder %s934_s27, %s697_s25  ;;  %p706_p5 = scmp.lt.s32.totalorder %s697_s25, %s697_s25 }
  0x36   : > { %p700_p8 = pnand %p698_p6, %p946_p13  ;;  %p707_p7 = por %p706_p5, %p705_p3 }
  0x38   : > { %p701_p0 = pneg %p700_p8 }
  0x3a   : > { %p708_p10 = pnand %p707_p7, %p701_p0 }
  0x3c   : > { %711 = shalt.err (!%p708_p10)
}
  0x3d   : > { %584 = dma.hbm_to_vmem [thread:$0]  (!%p930_p11), %s1148_s2, 128, %s934_s27, [#allocation6]  }
  0x3e   : > { %s712_s14 = scalar_lea.hbm %s1149_s3, 128 }
  0x3f   : > { %p713_p9 = scmp.ne.s32.totalorder %s1149_s3, %s712_s14  ;;  %p719_p1 = scmp.lt.u32.totalorder %s712_s14, %s1149_s3 }
  0x41   : > { %p715_p12 = pnand %p713_p9, %p946_p13 }
  0x43   : > { %p716_p2 = pneg %p715_p12 }
  0x45   : > { %p721_p4 = pnand %p719_p1, %p716_p2 }
  0x47   : > { %724 = shalt.err (!%p721_p4)
}
  0x48   : > { %s725_s27 = scalar_lea.vmem %s936_s30, 128  ;;  %p733_p3 = scmp.lt.s32.totalorder %s936_s30, %s936_s30 }
  0x49   : > { %p726_p6 = scmp.ne.s32.totalorder %s936_s30, %s725_s27  ;;  %p734_p5 = scmp.lt.s32.totalorder %s725_s27, %s725_s27 }
  0x4b   : > { %p728_p8 = pnand %p726_p6, %p946_p13  ;;  %p735_p7 = por %p734_p5, %p733_p3 }
  0x4d   : > { %p729_p0 = pneg %p728_p8 }
  0x4f   : > { %p736_p10 = pnand %p735_p7, %p729_p0 }
  0x51   : > { %739 = shalt.err (!%p736_p10)
}
  0x52   : > { %587 = dma.hbm_to_vmem [thread:$0]  (!%p930_p11), %s1149_s3, 128, %s936_s30, [#allocation9]  }
  0x53   : > { %s1009_s10 = sadd.s32 1, %s844_s18   ;;  %s29_s7 = sadd.s32 1, %s840_s17 }
  0x54   : > { %s26_s28 = ssub.s32 %s844_s18, %s1009_s10  ;;  %p36_p9 = scmp.ne.s32.totalorder %s840_s17, %s836_s16 }
  0x55   : > { %p27_p13 = scmp.eq.s32.totalorder %s26_s28, 0  ;;  %p37_p12 = scmp.eq.s32.totalorder %s844_s18, 0 }
  0x56   : > { %p599_p2 = scmp.lt.s32.totalorder %s844_s18, 2  ;;  %p1159_p4 = scmp.eq.s32.totalorder %s902_s19, 1 }
  0x57   : > { %s1019_s8 = scalar_select %p27_p13, %s840_s17, %s29_s7  }
  0x58   : > { %p38_p1 = por %p37_p12, %p36_p9  ;;  %p1023_p6 = por %p1159_p4, %p36_p9 }
  0x59   : > { %s188_s9 = sand.u32 1, %s840_s17   ;;  %s532_s11 = sshll.u32 %s844_s18, 10 }
  0x5a   : > { %s511_s30 = sshll.u32 %s188_s9, 6  ;;  %s1032_s14 = scalar_lea.hbm %s1146_s0, %s532_s11 }
  0x5b   : > { %s192_s20 = scalar_lea.vmem [#allocation2], %s511_s30  ;;  %p1034_p11 = pnand %p599_p2, %p38_p1 }
  0x5c   : > { %s199_s24 = sshll.u32 %s192_s20, 4  ;;  %s1040_s29 = scalar_lea.sflag [#allocation3], %s188_s9  ;;  %s1038_s24 = int_to_ptr.vmem [resolvable:$true] %s199_s24 }
  0x5d   : > { %s740_s27 = scalar_lea.hbm %s1032_s14, 1024  ;;  %p742_p0 = pneg %p1034_p11 }
  0x5e   : > { %p741_p8 = scmp.ne.s32.totalorder %s1032_s14, %s740_s27  ;;  %s745_s28 = scalar_lea.hbm %s1146_s0, 2048 }
  0x5f   : > { %p746_p7 = scmp.lt.u32.totalorder %s1032_s14, %s1146_s0  ;;  %p747_p10 = scmp.lt.u32.totalorder %s745_s28, %s740_s27 }
  0x60   : > { %p743_p3 = pnand %p742_p0, %p741_p8  ;;  %p749_p9 = scmp.lt.u32.totalorder %s740_s27, %s1032_s14 }
  0x61   : > { %p748_p13 = por %p747_p10, %p746_p7 }
  0x62   : > { %p744_p5 = pneg %p743_p3 }
  0x63   : > { %p750_p12 = por %p749_p9, %p748_p13 }
  0x65   : > { %p751_p2 = pnand %p750_p12, %p744_p5 }
  0x67   : > { %754 = shalt.err (!%p751_p2)
}
  0x68   : > { %s755_s9 = scalar_lea.vmem %s1038_s24, 1024  ;;  %s849_s30 = smov [#allocation2]  }
  0x69   : > { %p756_p1 = scmp.ne.s32.totalorder %s1038_s24, %s755_s9  ;;  %s760_s12 = sshll.u32 %s849_s30, 4  ;;  %s761_s12 = int_to_ptr.vmem [resolvable:$false] %s760_s12 }
  0x6a   : > { %s762_s13 = scalar_lea.vmem %s761_s12, 2048  ;;  %p763_p3 = scmp.lt.s32.totalorder %s1038_s24, %s761_s12 }
  0x6b   : > { %p758_p4 = pnand %p756_p1, %p742_p0  ;;  %p764_p7 = scmp.lt.s32.totalorder %s762_s13, %s755_s9 }
  0x6d   : > { %p759_p8 = pneg %p758_p4  ;;  %p765_p10 = por %p764_p7, %p763_p3 }
  0x6f   : > { %p766_p13 = pnand %p765_p10, %p759_p8 }
  0x71   : > { %769 = shalt.err (!%p766_p13)
}
  0x72   : > { %s850_s20 = smov 64   ;;  %s851_s27 = smov 4  }
  0x73   : > { %591 = dma.hbm_to_vmem [thread:$0]  (!%p1034_p11), %s1032_s14, 1024, %s1038_s24, %s1040_s29, %s850_s20, %s850_s20, %s851_s27  }
  0x74   : > { %p1162_p0 = scmp.ne.s32.totalorder %s1156_s23, 0 }
  0x75   : > { %s1071_s5 = sand.u32 (!%p1162_p0), 1, %s836_s16   ;;  %p1163_p5 = scmp.ne.s32.totalorder (!%p1162_p0), %s1154_s21, 0 }
  0x76   : > { %211 = sbr.rel (%p1162_p0) target bundleno = 697 (0x2b9), region = 36  ;;  %s515_s6 = sshll.u32 (!%p1162_p0), %s1071_s5, 6 }
  0x77   : > { %s214_s28 = scalar_lea.sflag (!%p1162_p0), [#allocation3], %s1071_s5  ;;  %s1075_s7 = scalar_lea.vmem (!%p1162_p0), [#allocation2], %s515_s6 }
  0x7d   : > { %815 = dma.done.wait (%p1163_p5), %s214_s28, 1024  }
  0x7e   : > { %817 = vsyncadd (%p1163_p5), %s214_s28, 4294966272  ;;  %p1164_p11 = scmp.eq.s32.totalorder %s902_s19, 0 }
  0x80   : > { %819 = dma.done.wait (%p1164_p11), [#allocation6], 192   ;;  %p1165_p9 = pmov %p1164_p11 }
  0x82   : > { %821 = vsyncadd (%p1165_p9), [#allocation6], 4294967104  ;;  %p1166_p12 = pmov %p1165_p9 }
  0x83   : > { %p1167_p2 = pmov %p1165_p9 }
  0x84   : > { %823 = dma.done.wait (%p1166_p12), [#allocation9], 128  }
  0x85   : > { %825 = vsyncadd (%p1167_p2), [#allocation9], 4294967168  ;;  %v852_v0 = vmov 0.0   ;;  %vm853_vm0 = vmmov 0   ;;  %v646_v1 = vld [vmem:[%s1075_s7] sm:$0xff]   ;;  %v647_v2 = vld [vmem:[%s1075_s7 + $0x8] sm:$0xff]  }
  0x86   : > { %542 = vmatprep.subr.bf16.mxu0 %v852_v0  ;;  %558 = vmatprep.mubr.msk.bf16.mxu0 %vm853_vm0, %v852_v0  ;;  %v648_v3 = vld [vmem:[%s1075_s7 + $0x10] sm:$0xff]   ;;  %v649_v4 = vld [vmem:[%s1075_s7 + $0x18] sm:$0xff]   ;;  %v650_v5 = vld [vmem:[%s1075_s7 + $0x20] sm:$0xff]   ;;  %v854_v15 = vmov 0   ;;  %s519_s21 = sshll.u32 %s1071_s5, 2  ;;  %s529_s23 = sshll.u32 %s902_s19, 6 }
  0x87   : > { %543 = vmatpush3.bf16.msra.mxu0 %v646_v1  ;;  %v651_v6 = vld [vmem:[%s1075_s7 + $0x28] sm:$0xff]   ;;  %v652_v7 = vld [vmem:[%s1075_s7 + $0x30] sm:$0xff]   ;;  %v653_v8 = vld [vmem:[%s1075_s7 + $0x38] sm:$0xff]   ;;  %644 = vset.pattern.permute.xlu1 %v854_v15  ;;  %s253_s14 = scalar_lea.vmem [#allocation10], %s519_s21  ;;  %s1102_s11 = scalar_lea.hbm %s1150_s4, %s529_s23 }
  0x88   : > { %544 = vmatprep.subr.bf16.mxu0 %v852_v0  ;;  %v255_v9 = vld [vmem:[#allocation5] sm:$0xf]  ;;  %645 = vset.pattern.permute.xlu0 %v854_v15  ;;  %v360_v24 = vld [vmem:[#allocation7] sm:$0xff]  ;;  %v361_v27 = vld [vmem:[#allocation8] sm:$0xff]  ;;  %s406_s24 = sshll.u32 %s253_s14, 4  ;;  %s393_s9 = scalar_lea.sflag [#allocation4], %s1071_s5  ;;  %s1104_s24 = int_to_ptr.vmem [resolvable:$true] %s406_s24 }
  0x89   : > { %s770_s30 = scalar_lea.vmem %s1104_s24, 64  ;;  %s855_s19 = smov [#allocation10]  }
  0x8a   : > { %p771_p1 = scmp.ne.s32.totalorder %s1104_s24, %s770_s30  ;;  %s774_s12 = sshll.u32 %s855_s19, 4  ;;  %s775_s12 = int_to_ptr.vmem [resolvable:$false] %s774_s12 }
  0x8b   : > { %545 = vmatpush3.bf16.msra.mxu0 %v647_v2  ;;  %s776_s13 = scalar_lea.vmem %s775_s12, 128  ;;  %p777_p3 = scmp.lt.s32.totalorder %s1104_s24, %s775_s12 }
  0x8c   : > { %546 = vmatprep.subr.bf16.mxu0 %v852_v0  ;;  %p772_p4 = pnand %p771_p1, %p1023_p6  ;;  %p778_p7 = scmp.lt.s32.totalorder %s776_s13, %s770_s30 }
  0x8e   : > { %p773_p8 = pneg %p772_p4  ;;  %p779_p10 = por %p778_p7, %p777_p3 }
  0x8f   : > { %547 = vmatpush3.bf16.msra.mxu0 %v648_v3 }
  0x90   : > { %548 = vmatprep.subr.bf16.mxu0 %v852_v0  ;;  %p780_p13 = pnand %p779_p10, %p773_p8 }
  0x93   : > { %549 = vmatpush3.bf16.msra.mxu0 %v649_v4 }
  0x94   : > { %550 = vmatprep.subr.bf16.mxu0 %v852_v0 }
  0x97   : > { %551 = vmatpush3.bf16.msra.mxu0 %v650_v5 }
  0x98   : > { %552 = vmatprep.subr.bf16.mxu0 %v852_v0 }
  0x9b   : > { %553 = vmatpush3.bf16.msra.mxu0 %v651_v6 }
  0x9c   : > { %554 = vmatprep.subr.bf16.mxu0 %v852_v0 }
  0x9f   : > { %555 = vmatpush3.bf16.msra.mxu0 %v652_v7 }
  0xa0   : > { %556 = vmatprep.subr.bf16.mxu0 %v852_v0 }
  0xa3   : > { %557 = vmatpush3.bf16.msra.mxu0 %v653_v8 }
  0xa6   : > { %559 = vmatmul.mubr.bf16.vlgmr.msra.gmra.mrb[0].mxu0 %v255_v9 }
 0x179   : > { %v354_v10 = vpop.f32.mrb[0].mxu0 }
 0x17a   : > { %362 = vadd.xlane.f32.xlu0 %v354_v10  ;;  %v560_v11 = vpop.f32.mrb[1].mxu0  ;;  %v364_v14 = vmul.f32 %v354_v10, %v354_v10 }
 0x17b   : > { %v357_v12 = vpop.f32.mrb[2].mxu0 }
 0x17c   : > { %v561_v13 = vpop.f32.mrb[3].mxu0 }
 0x17e   : > { %365 = vadd.xlane.f32.xlu0 %v364_v14 }
 0x207   : > { %v363_v16 = vpop.xlane.xlu0 %362 }
 0x208   : > { %v367_v17 = vmul.f32 0.015625, %v363_v16 }
 0x20a   : > { %v369_v19 = vmul.f32 %v367_v17, %v367_v17 }
 0x20b   : > { %v366_v18 = vpop.xlane.xlu0 %365 }
 0x20c   : > { %v368_v20 = vmul.f32 0.015625, %v366_v18 }
 0x20e   : > { %v370_v21 = vsub.f32 %v368_v20, %v369_v19 }
 0x210   : > { %v371_v22 = vmax.f32 %v370_v21, 0.0 }
 0x212   : > { %v372_v23 = vadd.f32 1e-05, %v371_v22 }
 0x214   : > { %654 = vrsqrt.f32 %v372_v23 }
 0x21e   : > { %v655_v25 = vpop.eup %654 }
 0x21f   : > { %v374_v26 = vmul.f32 %v655_v25, %v360_v24 }
 0x221   : > { %379 = vperm.xlu1 %644, %v374_v26   ;;  %v375_v28 = vmul.f32 %v374_v26, %v367_v17 }
 0x223   : > { %v376_v29 = vsub.f32 %v361_v27, %v375_v28 }
 0x225   : > { %385 = vperm.xlu1 %644, %v376_v29  }
 0x2a0   : > { %v380_v30 = vpop.permute.xlu1 %379 }
 0x2a1   : > { %v382_v31 = vmul.f32 %v380_v30, %v354_v10 }
 0x2a4   : > { %v386_v32 = vpop.permute.xlu1 %385 }
 0x2a5   : > { %v388_v33 = vadd.f32 %v386_v32, %v382_v31 }
 0x2a7   : > { %v389_v34 = vmax.f32 %v388_v33, 0.0 }
 0x2a9   : > { %v390_v35 = vpack.c.bf16 %v389_v34, %v389_v34 }
 0x2ab   : > { %391 = vst [vmem:[%s253_s14] sm:$0xf] %v390_v35 }
 0x2ac   : > { %783 = shalt.err (!%p780_p13)
}
 0x2ad   : > { %s784_s20 = scalar_lea.hbm %s1102_s11, 64  ;;  %s788_s6 = scalar_lea.hbm %s1150_s4, 128 }
 0x2ae   : > { %p785_p0 = scmp.ne.s32.totalorder %s1102_s11, %s784_s20  ;;  %p789_p9 = scmp.lt.u32.totalorder %s1102_s11, %s1150_s4 }
 0x2af   : > { %p790_p12 = scmp.lt.u32.totalorder %s788_s6, %s784_s20  ;;  %p792_p1 = scmp.lt.u32.totalorder %s784_s20, %s1102_s11 }
 0x2b0   : > { %p786_p5 = pnand %p785_p0, %p1023_p6 }
 0x2b1   : > { %p791_p2 = por %p790_p12, %p789_p9 }
 0x2b2   : > { %p787_p11 = pneg %p786_p5 }
 0x2b3   : > { %p793_p4 = por %p792_p1, %p791_p2 }
 0x2b5   : > { %p794_p8 = pnand %p793_p4, %p787_p11 }
 0x2b7   : > { %797 = shalt.err (!%p794_p8)
}
 0x2b8   : > { %576 = dma.vmem_to_hbm [thread:$0]  (%p1023_p6), %s1104_s24, 64, %s1102_s11, %s393_s9  }
 0x2b9 PF: > { %s418_s21 = sand.u32 1, %s832_s15   ;;  %p1168_p3 = scmp.ne.s32.totalorder %s1155_s22, 0 }
 0x2ba   : > { %p1169_p7 = scmp.ge.s32.totalorder %s844_s18, 2  ;;  %s419_s23 = scalar_lea.sflag [#allocation4], %s418_s21 }
 0x2bc   : > { %p593_p10 = pnand %p1169_p7, %p1168_p3 }
 0x2be   : > { %827 = dma.done.wait (!%p593_p10), %s419_s23, 64  }
 0x2bf   : > { %829 = vsyncadd (!%p593_p10), %s419_s23, 4294967232  ;;  %p19_p13 = scmp.ge.s32.totalorder %s1009_s10, 4   ;;  %s1170_s15 = smov %s836_s16 }
 0x2c0   : > { %s1171_s16 = smov %s840_s17  ;;  %s1172_s17 = smov %s1019_s8 }
 0x2c1   : > { %s1173_s18 = smov %s1009_s10  ;;  %21 = sbr.rel (!%p19_p13) target bundleno = 7 (0x7), region = 93 }
 0x2c8   :  { %424 = vsyncpa [#allocation3], 1 }
 0x2c9   :  { %426 = vsyncpa [#allocation3 + $0x1], 1 }
 0x2ca   :  { %427 = vsyncpa [#allocation6], 1 }
 0x2cb   :  { %428 = vsyncpa [#allocation9], 1 }
 0x2cc   :  { %429 = vsyncpa [#allocation4], 1 }
 0x2cd   :  { %431 = vsyncpa [#allocation4 + $0x1], 1 }

</bundles_post_ra>
